<compile_context>
chip_gen: v7x
topology: tpu7x:2x2x1
jax: 0.10.0
libtpu: 0.0.40
codegen_flags: <defaults>
</compile_context>

<pallas_src>
import jax
import jax.numpy as jnp
from jax.experimental import pallas as pl
from jax.experimental.pallas import tpu as pltpu


def _round_up(n, m):
    return (n + m - 1) // m * m


def actor_critic_kernel(x_ref, w1_ref, b1_ref, wh_ref, bh_ref, out_ref):
    # In-kernel f32 -> bf16 cast of the activations (VPU, hidden under the DMA).
    x = x_ref[...].astype(w1_ref.dtype)
    # Hidden layer: bf16 operands, f32 MXU accumulation; bias + ReLU in f32
    # on the VPU (v5e has no bf16 VPU).
    h = jnp.dot(x, w1_ref[...], preferred_element_type=jnp.float32)
    h = jnp.maximum(h + b1_ref[...], 0.0)
    # Fused policy+value head: single MXU pass, lane-dense 128-wide output block.
    out_ref[...] = (
        jnp.dot(h.astype(wh_ref.dtype), wh_ref[...],
                preferred_element_type=jnp.float32)
        + bh_ref[...]
    ).astype(out_ref.dtype)


def prepare_params(w1, b1, wp, bp, wv, bv, *, mm_dtype=jnp.bfloat16):
    """One-time weight preparation — keep OUT of the per-step hot path.

    Fuses the policy & value heads into a single [hidden, action_dim+1] matrix,
    zero-pads hidden to a multiple of 128 (lane-dense intermediate) and the head
    output to 128 lanes (lane-dense output block), and casts matmul operands to
    `mm_dtype` (bf16 by default; pass jnp.float32 for exact-f32 parity at ~half
    MXU throughput).
    """
    state_dim, hidden = w1.shape
    action_dim = wp.shape[1]
    n_head = action_dim + 1
    hidden_pad = _round_up(hidden, 128)
    n_pad = _round_up(n_head, 128)

    wh = jnp.concatenate([wp, wv], axis=1)                   # [hidden, n_head]
    bh = jnp.concatenate([bp, bv], axis=1)                   # [1, n_head]

    w1_p = jnp.pad(w1, ((0, 0), (0, hidden_pad - hidden))).astype(mm_dtype)
    b1_p = jnp.pad(b1, ((0, 0), (0, hidden_pad - hidden))).astype(jnp.float32)
    wh_p = jnp.pad(wh, ((0, hidden_pad - hidden), (0, n_pad - n_head))).astype(mm_dtype)
    bh_p = jnp.pad(bh, ((0, 0), (0, n_pad - n_head))).astype(jnp.float32)

    return dict(w1=w1_p, b1=b1_p, wh=wh_p, bh=bh_p,
                action_dim=action_dim, n_pad=n_pad)


def _choose_tile_b(B, cap=1024):
    """Batch tile: big (per-step overhead ~0.35us), minimal padding waste,
    >= 2 grid steps when possible so v7x's two TensorCores both get work."""
    if B < 16:
        return B                           # single full-extent block
    n_tiles = max(pl.cdiv(B, cap), 2)
    return _round_up(pl.cdiv(B, n_tiles), 8)


def actor_critic_forward(x, prepared, *, tile_b=1024, out_dtype=jnp.float32):
    """Fused ActorCritic forward.

    Returns (policy_logits [B, action_dim], value [B, 1]) in float32.
    """
    B, state_dim = x.shape
    w1_p, b1_p = prepared["w1"], prepared["b1"]
    wh_p, bh_p = prepared["wh"], prepared["bh"]
    action_dim = prepared["action_dim"]
    n_pad = prepared["n_pad"]
    hidden_pad = w1_p.shape[1]

    tb = _choose_tile_b(B, tile_b)
    grid = (pl.cdiv(B, tb),)               # Pallas masks the final partial block

    flops = 2 * B * (state_dim * hidden_pad + hidden_pad * n_pad)
    bytes_accessed = (
        x.size * x.dtype.itemsize
        + w1_p.size * w1_p.dtype.itemsize + wh_p.size * wh_p.dtype.itemsize
        + b1_p.size * 4 + bh_p.size * 4
        + B * n_pad * jnp.dtype(out_dtype).itemsize
    )

    out = pl.pallas_call(
        actor_critic_kernel,
        out_shape=jax.ShapeDtypeStruct((B, n_pad), out_dtype),
        grid_spec=pltpu.PrefetchScalarGridSpec(
            num_scalar_prefetch=0,
            grid=grid,
            in_specs=[
                # Activations: blocked along the batch grid (double-buffered DMA).
                pl.BlockSpec((tb, state_dim), lambda i: (i, 0)),
                # Weights / biases: constant index_map -> VMEM-resident across steps.
                pl.BlockSpec((state_dim, hidden_pad), lambda i: (0, 0)),
                pl.BlockSpec((1, hidden_pad), lambda i: (0, 0)),
                pl.BlockSpec((hidden_pad, n_pad), lambda i: (0, 0)),
                pl.BlockSpec((1, n_pad), lambda i: (0, 0)),
            ],
            out_specs=pl.BlockSpec((tb, n_pad), lambda i: (i, 0)),
        ),
        compiler_params=pltpu.CompilerParams(
            dimension_semantics=("parallel",),
        ),
        cost_estimate=pl.CostEstimate(
            flops=flops, transcendentals=0, bytes_accessed=bytes_accessed),
    )(x, w1_p, b1_p, wh_p, bh_p)

    logits = out[:, :action_dim].astype(jnp.float32)
    value = out[:, action_dim:action_dim + 1].astype(jnp.float32)
    return logits, value


def init_params(key, state_dim, action_dim, hidden_dim):
    """Deterministic init mimicking PyTorch nn.Linear default
    (U(-1/sqrt(fan_in), +1/sqrt(fan_in)))."""
    ks = jax.random.split(key, 6)

    def lin(kw, kb, fan_in, fan_out):
        bound = 1.0 / jnp.sqrt(jnp.float32(fan_in))
        w = jax.random.uniform(kw, (fan_in, fan_out), jnp.float32, -bound, bound)
        b = jax.random.uniform(kb, (1, fan_out), jnp.float32, -bound, bound)
        return w, b

    w1, b1 = lin(ks[0], ks[1], state_dim, hidden_dim)
    wp, bp = lin(ks[2], ks[3], hidden_dim, action_dim)
    wv, bv = lin(ks[4], ks[5], hidden_dim, 1)
    return w1, b1, wp, bp, wv, bv


def _reference(x, w1, b1, wp, bp, wv, bv):
    """Pure-JAX reference matching the kernel's bf16-operand / f32-accum math."""
    bf = lambda a: a.astype(jnp.bfloat16)
    h = jnp.maximum(
        jnp.dot(bf(x), bf(w1), preferred_element_type=jnp.float32) + b1, 0.0)
    hb = bf(h)
    logits = jnp.dot(hb, bf(wp), preferred_element_type=jnp.float32) + bp
    value = jnp.dot(hb, bf(wv), preferred_element_type=jnp.float32) + bv
    return logits, value


if __name__ == "__main__":
    state_dim = 8
    action_dim = 2
    hidden_dim = 64

    key = jax.random.PRNGKey(0)
    kx1, kx2, kx3, kp = jax.random.split(key, 4)
    params = init_params(kp, state_dim, action_dim, hidden_dim)
    prepared = prepare_params(*params)      # one-time weight prep, off the hot path

    def check(x, out_dtype=jnp.float32, tol=1e-2):
        logits, value = actor_critic_forward(x, prepared, out_dtype=out_dtype)
        logits = jax.block_until_ready(logits)
        value = jax.block_until_ready(value)
        logits_ref, value_ref = _reference(x, *params)
        assert logits.shape == (x.shape[0], action_dim)
        assert value.shape == (x.shape[0], 1)
        assert jnp.allclose(logits, logits_ref, atol=tol, rtol=tol)
        assert jnp.allclose(value, value_ref, atol=tol, rtol=tol)

    # Small batch: single full-extent block, one grid step.
    check(jax.random.normal(kx1, (2, state_dim), jnp.float32))
    # Larger batch: two even 192-row tiles (both v7x TensorCores busy, no padding).
    check(jax.random.normal(kx2, (384, state_dim), jnp.float32))
    # Non-divisible batch: exercises Pallas' masked final partial block (no jnp.pad).
    check(jax.random.normal(kx3, (50, state_dim), jnp.float32))
    # bf16 output path (halves output write bandwidth; mainly useful on v5e).
    check(jax.random.normal(kx2, (384, state_dim), jnp.float32),
          out_dtype=jnp.bfloat16, tol=5e-2)

    print("KERNEL_OK")
</pallas_src>

<mosaic_0001>
module attributes {stable_mosaic.version = 11 : i64} {
  func.func @actor_critic_kernel(%arg0: i32, %arg1: memref<2x8xf32, #tpu.memory_space<vmem>>, %arg2: memref<8x128xbf16, #tpu.memory_space<vmem>>, %arg3: memref<1x128xf32, #tpu.memory_space<vmem>>, %arg4: memref<128x128xbf16, #tpu.memory_space<vmem>>, %arg5: memref<1x128xf32, #tpu.memory_space<vmem>>, %arg6: memref<2x128xf32, #tpu.memory_space<vmem>>) attributes {dimension_semantics = [#tpu.dimension_semantics<parallel>], iteration_bounds = array<i64: 1>, scalar_prefetch = 0 : i64, scratch_operands = 0 : i64, tpu.core_type = #tpu.core_type<tc>, window_params = [{transform_indices = @transform_0, window_bounds = array<i64: 2, 8>}, {pipeline_mode = #tpu.pipeline_mode<synchronous>, transform_indices = @transform_1, window_bounds = array<i64: 8, 128>}, {pipeline_mode = #tpu.pipeline_mode<synchronous>, transform_indices = @transform_2, window_bounds = array<i64: 1, 128>}, {pipeline_mode = #tpu.pipeline_mode<synchronous>, transform_indices = @transform_3, window_bounds = array<i64: 128, 128>}, {pipeline_mode = #tpu.pipeline_mode<synchronous>, transform_indices = @transform_4, window_bounds = array<i64: 1, 128>}, {transform_indices = @transform_5, window_bounds = array<i64: 2, 128>}]} {
    %c0 = arith.constant 0 : index
    %c0_0 = arith.constant 0 : index
    %0 = vector.load %arg1[%c0, %c0_0] : memref<2x8xf32, #tpu.memory_space<vmem>>, vector<2x8xf32>
    %1 = arith.truncf %0 : vector<2x8xf32> to vector<2x8xbf16>
    %c0_1 = arith.constant 0 : index
    %c0_2 = arith.constant 0 : index
    %2 = vector.load %arg2[%c0_1, %c0_2] : memref<8x128xbf16, #tpu.memory_space<vmem>>, vector<8x128xbf16>
    %cst = arith.constant dense<0.000000e+00> : vector<2x128xf32>
    %3 = tpu.matmul %1, %2, %cst {dimension_numbers = #tpu.dot_dimension_numbers<[1], [0], [0], [1], [0, 0, 1, 1], [], []>} : vector<2x8xbf16>, vector<8x128xbf16>, vector<2x128xf32> -> vector<2x128xf32>
    %c0_3 = arith.constant 0 : index
    %c0_4 = arith.constant 0 : index
    %4 = vector.load %arg3[%c0_3, %c0_4] : memref<1x128xf32, #tpu.memory_space<vmem>>, vector<1x128xf32>
    %5 = vector.broadcast %4 : vector<1x128xf32> to vector<2x128xf32>
    %6 = arith.addf %3, %5 : vector<2x128xf32>
    %cst_5 = arith.constant 0.000000e+00 : f32
    %7 = vector.broadcast %cst_5 : f32 to vector<2x128xf32>
    %8 = arith.maximumf %6, %7 : vector<2x128xf32>
    %9 = arith.truncf %8 : vector<2x128xf32> to vector<2x128xbf16>
    %c0_6 = arith.constant 0 : index
    %c0_7 = arith.constant 0 : index
    %10 = vector.load %arg4[%c0_6, %c0_7] : memref<128x128xbf16, #tpu.memory_space<vmem>>, vector<128x128xbf16>
    %cst_8 = arith.constant dense<0.000000e+00> : vector<2x128xf32>
    %11 = tpu.matmul %9, %10, %cst_8 {dimension_numbers = #tpu.dot_dimension_numbers<[1], [0], [0], [1], [0, 0, 1, 1], [], []>} : vector<2x128xbf16>, vector<128x128xbf16>, vector<2x128xf32> -> vector<2x128xf32>
    %c0_9 = arith.constant 0 : index
    %c0_10 = arith.constant 0 : index
    %12 = vector.load %arg5[%c0_9, %c0_10] : memref<1x128xf32, #tpu.memory_space<vmem>>, vector<1x128xf32>
    %13 = vector.broadcast %12 : vector<1x128xf32> to vector<2x128xf32>
    %14 = arith.addf %11, %13 : vector<2x128xf32>
    %c0_11 = arith.constant 0 : index
    %c0_12 = arith.constant 0 : index
    %15 = vector.load %arg6[%c0_11, %c0_12] : memref<2x128xf32, #tpu.memory_space<vmem>>, vector<2x128xf32>
    tpu.vector_store %arg6[%c0_11, %c0_12], %14 {strides = array<i32>} : memref<2x128xf32, #tpu.memory_space<vmem>>, vector<2x128xf32>,
    return
  }
  func.func @transform_0(%arg0: i32) -> (i32, i32) {
    %c0_i32 = arith.constant 0 : i32
    %c0_i32_0 = arith.constant 0 : i32
    return %arg0, %c0_i32 : i32, i32
  }
  func.func @transform_1(%arg0: i32) -> (i32, i32) {
    %c0_i32 = arith.constant 0 : i32
    %c0_i32_0 = arith.constant 0 : i32
    %c0_i32_1 = arith.constant 0 : i32
    return %c0_i32, %c0_i32_0 : i32, i32
  }
  func.func @transform_2(%arg0: i32) -> (i32, i32) {
    %c0_i32 = arith.constant 0 : i32
    %c0_i32_0 = arith.constant 0 : i32
    %c0_i32_1 = arith.constant 0 : i32
    return %c0_i32, %c0_i32_0 : i32, i32
  }
  func.func @transform_3(%arg0: i32) -> (i32, i32) {
    %c0_i32 = arith.constant 0 : i32
    %c0_i32_0 = arith.constant 0 : i32
    %c0_i32_1 = arith.constant 0 : i32
    return %c0_i32, %c0_i32_0 : i32, i32
  }
  func.func @transform_4(%arg0: i32) -> (i32, i32) {
    %c0_i32 = arith.constant 0 : i32
    %c0_i32_0 = arith.constant 0 : i32
    %c0_i32_1 = arith.constant 0 : i32
    return %c0_i32, %c0_i32_0 : i32, i32
  }
  func.func @transform_5(%arg0: i32) -> (i32, i32) {
    %c0_i32 = arith.constant 0 : i32
    %c0_i32_0 = arith.constant 0 : i32
    return %arg0, %c0_i32 : i32, i32
  }
}

</mosaic_0001>

<bundles_post_ra>
// kernel: tpu_custom_call.1
= control target key start
LH: loop header
LB: loop body
LE: loop exit
PB: predicated region body
PF: predicated region fallthrough
CT: control target
= control target key end

     0   :  { %10 = vsyncpa [#allocation3], 0  ;;  %s497_s0 = inlined_call_operand.hbm [shape: f32[2,8], index: 0, kind: input, shape index: {}]   ;;  %s498_s1 = inlined_call_operand.hbm [shape: bf16[8,128], index: 1, kind: input, shape index: {}]   ;;  %s499_s2 = inlined_call_operand.vmem [shape: f32[1,128], index: 2, kind: input, shape index: {}]   ;;  %s500_s3 = inlined_call_operand.hbm [shape: bf16[128,128], index: 3, kind: input, shape index: {}]   ;;  %s501_s4 = inlined_call_operand.vmem [shape: f32[1,128], index: 4, kind: input, shape index: {}]   ;;  %s502_s5 = inlined_call_operand.hbm [shape: f32[2,128], index: 5, kind: output, shape index: {}]  }
   0x1   :  { %11 = vsyncpa [#allocation6], 0 }
   0x2   :  { %12 = vsyncpa [#allocation4], 0  ;;  %s405_s18 = smov [#allocation5]   ;;  %s406_s20 = smov [#allocation2]  }
   0x3   :  { %s29_s19 = sshll.u32 %s405_s18, 4  ;;  %s19_s21 = sshll.u32 %s406_s20, 4  ;;  %s30_s19 = int_to_ptr.vmem [resolvable:$true] %s29_s19  ;;  %s20_s21 = int_to_ptr.vmem [resolvable:$true] %s19_s21 }
   0x4   :  { %s311_s24 = scalar_lea.hbm %s498_s1, 64 }
   0x5   :  { %p312_p0 = scmp.ne.s32.totalorder %s498_s1, %s311_s24  ;;  %p315_p1 = scmp.lt.u32.totalorder %s311_s24, %s498_s1 }
   0x7   :  { %p317_p2 = pnand %p315_p1, %p312_p0 }
   0x9   :  { %320 = shalt.err (!%p317_p2)
}
   0xa   :  { %s321_s29 = scalar_lea.vmem %s30_s19, 64  ;;  %p326_p4 = scmp.lt.s32.totalorder %s30_s19, %s30_s19 }
   0xb   :  { %p322_p3 = scmp.ne.s32.totalorder %s30_s19, %s321_s29  ;;  %p327_p5 = scmp.lt.s32.totalorder %s321_s29, %s321_s29 }
   0xd   :  { %p328_p6 = por %p327_p5, %p326_p4 }
   0xf   :  { %p329_p7 = pnand %p328_p6, %p322_p3 }
  0x11   :  { %332 = shalt.err (!%p329_p7)
}
  0x12   :  { %32 = dma.hbm_to_vmem [thread:$0]  %s498_s1, 64, %s30_s19, [#allocation6]  }
  0x13   :  { %s333_s9 = scalar_lea.hbm %s497_s0, 32 }
  0x14   :  { %p334_p8 = scmp.ne.s32.totalorder %s497_s0, %s333_s9  ;;  %p337_p9 = scmp.lt.u32.totalorder %s333_s9, %s497_s0 }
  0x16   :  { %p339_p10 = pnand %p337_p9, %p334_p8 }
  0x18   :  { %342 = shalt.err (!%p339_p10)
}
  0x19   :  { %s343_s14 = scalar_lea.vmem %s20_s21, 32  ;;  %p348_p12 = scmp.lt.s32.totalorder %s20_s21, %s20_s21 }
  0x1a   :  { %p344_p11 = scmp.ne.s32.totalorder %s20_s21, %s343_s14  ;;  %p349_p13 = scmp.lt.s32.totalorder %s343_s14, %s343_s14 }
  0x1c   :  { %p350_p0 = por %p349_p13, %p348_p12 }
  0x1e   :  { %p351_p1 = pnand %p350_p0, %p344_p11 }
  0x20   :  { %354 = shalt.err (!%p351_p1)
}
  0x21   :  { %22 = dma.hbm_to_vmem [thread:$0]  %s497_s0, 32, %s20_s21, [#allocation3]  }
  0x22   :  { %s407_s16 = smov [#allocation7]   ;;  %s355_s20 = scalar_lea.hbm %s500_s3, 1024 }
  0x23   :  { %s40_s17 = sshll.u32 %s407_s16, 4  ;;  %p356_p2 = scmp.ne.s32.totalorder %s500_s3, %s355_s20  ;;  %s41_s17 = int_to_ptr.vmem [resolvable:$true] %s40_s17 }
  0x24   :  { %p359_p3 = scmp.lt.u32.totalorder %s355_s20, %s500_s3 }
  0x26   :  { %p361_p4 = pnand %p359_p3, %p356_p2 }
  0x28   :  { %364 = shalt.err (!%p361_p4)
}
  0x29   :  { %s365_s26 = scalar_lea.vmem %s41_s17, 1024  ;;  %p370_p6 = scmp.lt.s32.totalorder %s41_s17, %s41_s17 }
  0x2a   :  { %p366_p5 = scmp.ne.s32.totalorder %s41_s17, %s365_s26  ;;  %p371_p7 = scmp.lt.s32.totalorder %s365_s26, %s365_s26 }
  0x2c   :  { %p372_p8 = por %p371_p7, %p370_p6 }
  0x2e   :  { %p373_p9 = pnand %p372_p8, %p366_p5 }
  0x30   :  { %376 = shalt.err (!%p373_p9)
}
  0x31   :  { %s408_s0 = smov 64   ;;  %s409_s21 = smov 4  }
  0x32   :  { %46 = dma.hbm_to_vmem [thread:$0]  %s500_s3, 1024, %s41_s17, [#allocation6], %s408_s0, %s408_s0, %s409_s21  }
  0x33   :  { %399 = dma.done.wait [#allocation3], 32  }
  0x34   :  { %400 = vsyncadd [#allocation3], 4294967264 }
  0x35   :  { %401 = dma.done.wait [#allocation6], 1088  }
  0x36   :  { %402 = vsyncadd [#allocation6], 4294966208  ;;  %v410_v0 = vmov 0.0   ;;  %vm411_vm0 = vmmov 0   ;;  %vm73_vm1 = vcmask 1043456   ;;  %v303_v5 = vld [vmem:[#allocation7] sm:$0xff]  }
  0x37   :  { %269 = vmatprep.subr.bf16.mxu0 %v410_v0  ;;  %271 = vmatprep.mubr.msk.bf16.mxu0 %vm411_vm0, %v410_v0  ;;  %v61_v1 = vld [vmem:[#allocation5] sm:$0xf]  ;;  %v59_v2 = vld [vmem:[#allocation2] sm:$0x3]  ;;  %vm69_vm2 = vcmask 64512   ;;  %v304_v6 = vld [vmem:[#allocation7 + $0x8] sm:$0xff]  }
  0x38   :  { %275 = vmatprep.subr.bf16.mxu1 %v410_v0  ;;  %291 = vmatprep.mubr.msk.bf16.mxu1 %vm411_vm0, %v410_v0  ;;  %v75_v3 = vsel %vm73_vm1, %v61_v1, 0  ;;  %v60_v4 = vpack.c.bf16 %v59_v2, %v59_v2  ;;  %v305_v7 = vld [vmem:[#allocation7 + $0x10] sm:$0xff]   ;;  %v306_v8 = vld [vmem:[#allocation7 + $0x18] sm:$0xff]   ;;  %v307_v9 = vld [vmem:[#allocation7 + $0x20] sm:$0xff]   ;;  %s412_s7 = smov [#allocation8]  }
  0x39   :  { %270 = vmatpush3.bf16.msra.mxu0 %v75_v3  ;;  %276 = vmatpush3.bf16.msra.mxu1 %v303_v5  ;;  %v308_v10 = vld [vmem:[#allocation7 + $0x28] sm:$0xff]   ;;  %v309_v11 = vld [vmem:[#allocation7 + $0x30] sm:$0xff]   ;;  %v310_v12 = vld [vmem:[#allocation7 + $0x38] sm:$0xff]   ;;  %s237_s8 = sshll.u32 %s412_s7, 4  ;;  %s238_s8 = int_to_ptr.vmem [resolvable:$true] %s237_s8 }
  0x3a   :  { %277 = vmatprep.subr.bf16.mxu1 %v410_v0  ;;  %v247_v13 = vld [vmem:[%s499_s2] ss:$0 sm:$0xff]  ;;  %s377_s2 = scalar_lea.vmem %s238_s8, 32  ;;  %p382_p11 = scmp.lt.s32.totalorder %s238_s8, %s238_s8 }
  0x3b   :  { %v249_v21 = vld [vmem:[%s501_s4] ss:$0 sm:$0xff]  ;;  %p378_p10 = scmp.ne.s32.totalorder %s238_s8, %s377_s2  ;;  %p383_p12 = scmp.lt.s32.totalorder %s377_s2, %s377_s2 }
  0x3c   :  { %272 = vmatmul.mubr.msk.bf16.vlgmr.msra.gmra.mrb[0].mxu0 %vm69_vm2, %v60_v4 }
  0x3d   :  { %278 = vmatpush3.bf16.msra.mxu1 %v304_v6  ;;  %p384_p13 = por %p383_p12, %p382_p11 }
  0x3e   :  { %279 = vmatprep.subr.bf16.mxu1 %v410_v0 }
  0x3f   :  { %p385_p0 = pnand %p384_p13, %p378_p10 }
  0x41   :  { %280 = vmatpush3.bf16.msra.mxu1 %v305_v7 }
  0x42   :  { %281 = vmatprep.subr.bf16.mxu1 %v410_v0 }
  0x45   :  { %282 = vmatpush3.bf16.msra.mxu1 %v306_v8 }
  0x46   :  { %283 = vmatprep.subr.bf16.mxu1 %v410_v0 }
  0x49   :  { %284 = vmatpush3.bf16.msra.mxu1 %v307_v9 }
  0x4a   :  { %285 = vmatprep.subr.bf16.mxu1 %v410_v0 }
  0x4d   :  { %286 = vmatpush3.bf16.msra.mxu1 %v308_v10 }
  0x4e   :  { %287 = vmatprep.subr.bf16.mxu1 %v410_v0 }
  0x51   :  { %288 = vmatpush3.bf16.msra.mxu1 %v309_v11 }
  0x52   :  { %289 = vmatprep.subr.bf16.mxu1 %v410_v0 }
  0x55   :  { %290 = vmatpush3.bf16.msra.mxu1 %v310_v12 }
 0x10f   :  { %v111_v14 = vpop.f32.mrb[0].mxu0 }
 0x110   :  { %v112_v15 = vadd.f32 %v247_v13, %v111_v14  ;;  %v273_v16 = vpop.f32.mrb[1].mxu0 }
 0x111   :  { %v114_v17 = vpop.f32.mrb[2].mxu0 }
 0x112   :  { %v117_v18 = vmax.f32 %v112_v15, 0.0  ;;  %v274_v19 = vpop.f32.mrb[3].mxu0 }
 0x114   :  { %v118_v20 = vpack.c.bf16 %v117_v18, %v117_v18 }
 0x116   :  { %292 = vmatmul.mubr.bf16.vlgmr.msra.gmra.mrb[0].mxu1 %v118_v20 }
 0x1e9   :  { %v224_v22 = vpop.f32.mrb[0].mxu1 }
 0x1ea   :  { %v225_v23 = vadd.f32 %v249_v21, %v224_v22  ;;  %v293_v24 = vpop.f32.mrb[1].mxu1 }
 0x1eb   :  { %v227_v25 = vpop.f32.mrb[2].mxu1 }
 0x1ec   :  { %230 = vst [vmem:[#allocation8] sm:$0x3] %v225_v23  ;;  %v294_v26 = vpop.f32.mrb[3].mxu1 }
 0x1ed   :  { %388 = shalt.err (!%p385_p0)
}
 0x1ee   :  { %s389_s4 = scalar_lea.hbm %s502_s5, 32 }
 0x1ef   :  { %p390_p1 = scmp.ne.s32.totalorder %s502_s5, %s389_s4  ;;  %p393_p2 = scmp.lt.u32.totalorder %s389_s4, %s502_s5 }
 0x1f1   :  { %p395_p3 = pnand %p393_p2, %p390_p1 }
 0x1f3   :  { %398 = shalt.err (!%p395_p3)
}
 0x1f4   :  { %240 = dma.vmem_to_hbm [thread:$0]  %s238_s8, 32, %s502_s5, [#allocation4]  }
 0x1f5   :  { %403 = dma.done.wait [#allocation4], 32  }
 0x1f6   :  { %404 = vsyncadd [#allocation4], 4294967264 }
 0x1f7   :  { %244 = vsyncpa [#allocation3], 1 }
 0x1f8   :  { %245 = vsyncpa [#allocation6], 1 }
 0x1f9   :  { %246 = vsyncpa [#allocation4], 1 }

</bundles_post_ra>
